<compile_context>
chip_gen: v5e
topology: v5e:2x2
jax: 0.10.0
libtpu: 0.0.40
codegen_flags: <defaults>
</compile_context>

<pallas_src>
import jax
import jax.numpy as jnp
from jax.experimental import pallas as pl
from jax.experimental.pallas import tpu as pltpu


# ---------------------------------------------------------------------------
# Kernel: y = relu6(x + 3) / 6   (pure VPU elementwise, HBM-bandwidth bound)
# ---------------------------------------------------------------------------
def _h_sigmoid_kernel(x_ref, o_ref):
    x = x_ref[...]
    y = jnp.minimum(jnp.maximum(x + 3.0, 0.0), 6.0) * (1.0 / 6.0)
    o_ref[...] = y.astype(o_ref.dtype)


# ---------------------------------------------------------------------------
# Wrapper: lane-dense 2-D view, aligned row tiles, ragged tail via partial
# final block (no per-tile padding / slicing round trips through HBM).
# ---------------------------------------------------------------------------
def h_sigmoid(x, *, lane=1024, block_bytes=4 << 20):
    orig_shape = x.shape
    dtype = x.dtype
    n = x.size
    if n == 0:
        return x

    itemsize = jnp.dtype(dtype).itemsize
    pack = max(1, 4 // itemsize)            # elements per 32-bit sublane word
    align = 8 * pack                         # row alignment: 8 f32 / 16 bf16 / 32 i8
    max_rows = max(align, (block_bytes // (lane * itemsize) // align) * align)

    # Lane-dense 2-D view (rows, lane); every load/store uses full 128-lane
    # vregs.  Pad only the < lane-element ragged tail (skipped when exact).
    rows = pl.cdiv(n, lane)
    padded = rows * lane
    flat = x.reshape(-1)
    if padded != n:
        flat = jnp.pad(flat, (0, padded - n))
    x2d = flat.reshape(rows, lane)

    # Row tile: biggest aligned tile up to ~block_bytes per buffer; prefer a
    # grid of >= 2 steps when possible so v7x megacore has work to shard.
    if rows > max_rows:
        tm = max_rows
    elif rows >= 2 * align:
        tm = pl.cdiv(pl.cdiv(rows, 2), align) * align
    else:
        tm = rows  # single block; a full-dim block shape is always legal
    grid = pl.cdiv(rows, tm)

    out2d = pl.pallas_call(
        _h_sigmoid_kernel,
        out_shape=jax.ShapeDtypeStruct((rows, lane), dtype),
        grid_spec=pltpu.PrefetchScalarGridSpec(
            num_scalar_prefetch=0,
            grid=(grid,),
            in_specs=[pl.BlockSpec((tm, lane), lambda i: (i, 0))],
            out_specs=pl.BlockSpec((tm, lane), lambda i: (i, 0)),
        ),
        compiler_params=pltpu.CompilerParams(
            dimension_semantics=("parallel",),
            vmem_limit_bytes=32 << 20,
        ),
        cost_estimate=pl.CostEstimate(
            flops=4 * n, transcendentals=0, bytes_accessed=2 * n * itemsize
        ),
    )(x2d)

    if padded != n:
        return out2d.reshape(-1)[:n].reshape(orig_shape)
    return out2d.reshape(orig_shape)


# ---------------------------------------------------------------------------
# Pure-JAX reference (mirrors the PyTorch forward exactly)
# ---------------------------------------------------------------------------
def h_sigmoid_ref(x):
    return jnp.clip(x + 3.0, 0.0, 6.0) / 6.0


if __name__ == "__main__":
    key = jax.random.PRNGKey(0)

    # Small NCHW activation, consistent with how h_sigmoid is used inside the
    # MobileNetV2 strip-attention model.
    N, C, H, W = 2, 4, 16, 16
    x = 4.0 * jax.random.normal(key, (N, C, H, W), jnp.float32)

    out = jax.block_until_ready(h_sigmoid(x))
    assert out.shape == (N, C, H, W) and out.dtype == x.dtype
    err = float(jnp.max(jnp.abs(out - h_sigmoid_ref(x))))
    assert err < 1e-6, f"kernel/reference mismatch: max abs err {err}"

    # Ragged total size: exercises the lane-pad + partial row-tile path.
    x2 = 4.0 * jax.random.normal(jax.random.PRNGKey(1), (3, 5, 7, 11), jnp.float32)
    out2 = jax.block_until_ready(h_sigmoid(x2))
    err2 = float(jnp.max(jnp.abs(out2 - h_sigmoid_ref(x2))))
    assert err2 < 1e-6, f"ragged kernel/reference mismatch: max abs err {err2}"

    print("KERNEL_OK")
</pallas_src>

<mosaic_0001>
module attributes {stable_mosaic.version = 11 : i64} {
  func.func @_h_sigmoid_kernel(%arg0: i32, %arg1: memref<2x1024xf32, #tpu.memory_space<vmem>>, %arg2: memref<2x1024xf32, #tpu.memory_space<vmem>>) attributes {dimension_semantics = [#tpu.dimension_semantics<parallel>], iteration_bounds = array<i64: 1>, scalar_prefetch = 0 : i64, scratch_operands = 0 : i64, tpu.core_type = #tpu.core_type<tc>, window_params = [{transform_indices = @transform_0, window_bounds = array<i64: 2, 1024>}, {transform_indices = @transform_1, window_bounds = array<i64: 2, 1024>}]} {
    %c0 = arith.constant 0 : index
    %c0_0 = arith.constant 0 : index
    %0 = vector.load %arg1[%c0, %c0_0] : memref<2x1024xf32, #tpu.memory_space<vmem>>, vector<2x1024xf32>
    %cst = arith.constant 3.000000e+00 : f32
    %1 = vector.broadcast %cst : f32 to vector<2x1024xf32>
    %2 = arith.addf %0, %1 : vector<2x1024xf32>
    %cst_1 = arith.constant 0.000000e+00 : f32
    %3 = vector.broadcast %cst_1 : f32 to vector<2x1024xf32>
    %4 = arith.maximumf %2, %3 : vector<2x1024xf32>
    %cst_2 = arith.constant 6.000000e+00 : f32
    %5 = vector.broadcast %cst_2 : f32 to vector<2x1024xf32>
    %6 = arith.minimumf %4, %5 : vector<2x1024xf32>
    %cst_3 = arith.constant 0.166666672 : f32
    %7 = vector.broadcast %cst_3 : f32 to vector<2x1024xf32>
    %8 = arith.mulf %6, %7 : vector<2x1024xf32>
    %c0_4 = arith.constant 0 : index
    %c0_5 = arith.constant 0 : index
    %9 = vector.load %arg2[%c0_4, %c0_5] : memref<2x1024xf32, #tpu.memory_space<vmem>>, vector<2x1024xf32>
    tpu.vector_store %arg2[%c0_4, %c0_5], %8 {strides = array<i32>} : memref<2x1024xf32, #tpu.memory_space<vmem>>, vector<2x1024xf32>,
    return
  }
  func.func @transform_0(%arg0: i32) -> (i32, i32) {
    %c0_i32 = arith.constant 0 : i32
    %c0_i32_0 = arith.constant 0 : i32
    return %arg0, %c0_i32 : i32, i32
  }
  func.func @transform_1(%arg0: i32) -> (i32, i32) {
    %c0_i32 = arith.constant 0 : i32
    %c0_i32_0 = arith.constant 0 : i32
    return %arg0, %c0_i32 : i32, i32
  }
}

</mosaic_0001>

<bundles_post_ra>
// kernel: tpu_custom_call.1
= control target key start
LH: loop header
LB: loop body
LE: loop exit
PB: predicated region body
PF: predicated region fallthrough
CT: control target
= control target key end

     0   :  { %6 = vsyncpa [#allocation3], 0  ;;  %s124_s0 = inlined_call_operand.hbm [shape: f32[2,1024], index: 0, kind: input, shape index: {}]   ;;  %s125_s1 = inlined_call_operand.hbm [shape: f32[2,1024], index: 1, kind: output, shape index: {}]  }
   0x1   :  { %7 = vsyncpa [#allocation4], 0  ;;  %s13_s8 = sshll.u32 %s124_s0, 4  ;;  %s106_s9 = smov [#allocation2]   ;;  %s14_s8 = int_to_ptr.hbm [resolvable:$true] %s13_s8 }
   0x2   :  { %s15_s10 = sshll.u32 %s106_s9, 4  ;;  %s16_s10 = int_to_ptr.vmem [resolvable:$true] %s15_s10 }
   0x3   :  { %18 = dma.hbm_to_vmem [thread:$0]  %s14_s8, 256, %s16_s10, [#allocation3]  }
   0x4   :  { %102 = dma.done.wait [#allocation3], 256  }
   0x5   :  { %103 = vsyncadd [#allocation3], 4294967040  ;;  %v23_v0 = vld [vmem:[#allocation2] sm:$0xff]  ;;  %v24_v1 = vld [vmem:[#allocation2 + $0x8] sm:$0xff]  ;;  %s107_s11 = smov [#allocation5]   ;;  %s42_s0 = sshll.u32 %s125_s1, 4  ;;  %s43_s0 = int_to_ptr.hbm [resolvable:$true] %s42_s0 }
   0x6   :  { %v25_v2 = vadd.f32 3.0, %v23_v0  ;;  %v26_v3 = vadd.f32 3.0, %v24_v1  ;;  %s40_s12 = sshll.u32 %s107_s11, 4  ;;  %s41_s12 = int_to_ptr.vmem [resolvable:$true] %s40_s12 }
   0x8   :  { %v27_v4 = vmax.f32 %v25_v2, 0.0  ;;  %v28_v5 = vmax.f32 %v26_v3, 0.0 }
   0xa   :  { %v29_v6 = vmin.f32 %v27_v4, 6.0  ;;  %v30_v7 = vmin.f32 %v28_v5, 6.0 }
   0xc   :  { %v31_v8 = vmul.f32 0.16666667, %v29_v6  ;;  %v32_v9 = vmul.f32 0.16666667, %v30_v7 }
   0xe   :  { %33 = vst [vmem:[#allocation5] sm:$0xff] %v31_v8 }
   0xf   :  { %34 = vst [vmem:[#allocation5 + $0x8] sm:$0xff] %v32_v9 }
  0x10   :  { %45 = dma.vmem_to_hbm [thread:$0]  %s41_s12, 256, %s43_s0, [#allocation4]  }
  0x11   :  { %104 = dma.done.wait [#allocation4], 256  }
  0x12   :  { %105 = vsyncadd [#allocation4], 4294967040 }
  0x13   :  { %50 = vsyncpa [#allocation3], 1 }
  0x14   :  { %51 = vsyncpa [#allocation4], 1 }

</bundles_post_ra>
